<compile_context>
chip_gen: v7x
topology: tpu7x:2x2x1
jax: 0.10.0
libtpu: 0.0.40
codegen_flags: <defaults>
</compile_context>

<pallas_src>
import functools

import jax
import jax.numpy as jnp
from jax.experimental import pallas as pl
from jax.experimental.pallas import tpu as pltpu

_LANE = 128
_SUBLANE = 8
_ROW_ALIGN = 16            # bf16 packs 2 rows per sublane -> keep tiles 16-row aligned
_NEG_INF = -1e30           # finite "minus infinity" for padded logits
_VMEM_CAP = 32 * 1024 * 1024


def _round_up(x, m):
    return (x + m - 1) // m * m


def actor_kernel(s_ref, w1_ref, b1_ref, w2_ref, b2_ref, w3_ref, b3_ref, out_ref,
                 *, mxu_dtype):
    # In-kernel cast (VPU, hidden under DMA/MXU) so the wrapper streams raw f32.
    x = s_ref[...].astype(mxu_dtype)                           # (bt, S)

    # fc1 + ReLU -> (bt, 256); MXU with f32 accumulation, f32 elementwise.
    h1 = jnp.dot(x, w1_ref[...], preferred_element_type=jnp.float32) + b1_ref[...]
    h1 = jnp.maximum(h1, 0.0)

    # fc2 + ReLU -> (bt, 128)   (hidden 64 zero-padded to a full lane width)
    h2 = jnp.dot(h1.astype(w2_ref.dtype), w2_ref[...],
                 preferred_element_type=jnp.float32) + b2_ref[...]
    h2 = jnp.maximum(h2, 0.0)

    # action layer -> (bt, a_pad)   (padded logits carry a -1e30 f32 bias)
    logits = jnp.dot(h2.astype(w3_ref.dtype), w3_ref[...],
                     preferred_element_type=jnp.float32) + b3_ref[...]

    # Numerically stable softmax along the last axis (exact EUP reciprocal: free).
    m = jnp.max(logits, axis=-1, keepdims=True)
    e = jnp.exp(logits - m)
    inv = pl.reciprocal(jnp.sum(e, axis=-1, keepdims=True), approx=False)
    out_ref[...] = (e * inv).astype(out_ref.dtype)


def prepare_params(params, *, use_bf16=True):
    """One-time weight padding + dtype casts (hoisted out of the per-call path)."""
    w1, b1 = params["w1"], params["b1"]        # (S, 256),  (1, 256)
    w2, b2 = params["w2"], params["b2"]        # (256, 64), (1, 64)
    w3, b3 = params["w3"], params["b3"]        # (64, A),   (1, A)
    hidden2 = w2.shape[1]
    action_dim = w3.shape[1]

    h2_pad = _round_up(hidden2, _LANE)          # 64 -> 128 (lane-dense intermediate)
    a_pad = _round_up(action_dim, _SUBLANE)     # 6  -> 8   (narrow, DMA-cheap output)

    w2p = jnp.pad(w2, ((0, 0), (0, h2_pad - hidden2)))                   # zero cols
    b2p = jnp.pad(b2, ((0, 0), (0, h2_pad - hidden2)))                   # zero bias
    w3p = jnp.pad(w3, ((0, h2_pad - hidden2), (0, a_pad - action_dim)))  # zero rows/cols
    b3p = jnp.pad(b3, ((0, 0), (0, a_pad - action_dim)),
                  constant_values=_NEG_INF)     # padded logits -> exp() == 0 (f32 bias)

    mxu_dtype = jnp.bfloat16 if use_bf16 else jnp.float32
    return {
        "w1": w1.astype(mxu_dtype), "b1": b1.astype(jnp.float32),
        "w2": w2p.astype(mxu_dtype), "b2": b2p.astype(jnp.float32),
        "w3": w3p.astype(mxu_dtype), "b3": b3p.astype(jnp.float32),
        "action_dim": int(action_dim),
        "mxu_dtype": mxu_dtype,
    }


def discrete_actor_forward(state, prepped, *, batch_tile=None):
    """state: (B, state_dim) float32.  prepped: output of prepare_params().

    Returns (B, action_dim) float32 softmax probabilities."""
    B, state_dim = state.shape
    w1, b1 = prepped["w1"], prepped["b1"]
    w2, b2 = prepped["w2"], prepped["b2"]
    w3, b3 = prepped["w3"], prepped["b3"]
    action_dim = prepped["action_dim"]
    mxu_dtype = prepped["mxu_dtype"]
    hidden1 = w1.shape[1]
    h2_pad = w2.shape[1]
    a_pad = w3.shape[1]

    # ---- batch tiling -------------------------------------------------------
    if batch_tile is None:
        b16 = _round_up(B, _ROW_ALIGN)
        if B <= 512:
            batch_tile = b16                               # whole batch, one step
        elif B <= 2048:
            batch_tile = _round_up(-(-b16 // 2), 256)      # 2 tiles -> both v7x TCs busy
        else:
            batch_tile = 2048                              # amortize ~0.35us/step overhead
    batch_tile = _round_up(batch_tile, _ROW_ALIGN)

    # ---- VMEM budget (double-buffered streams + resident weights + temps) ---
    in_bytes = jnp.dtype(mxu_dtype).itemsize
    weight_bytes = ((w1.size + w2.size + w3.size) * in_bytes
                    + (b1.size + b2.size + b3.size) * 4)

    def tile_vmem(bt):
        return (2 * bt * state_dim * 4                      # f32 state tiles
                + 2 * bt * a_pad * 4                        # output tiles
                + 2 * weight_bytes                          # constant-index blocks
                + bt * (state_dim + hidden1 + h2_pad) * 4)  # cast + h1/h2 temporaries

    # Keep the working set well under the 32 MiB scoped cap (safe on v7x's 64 MiB).
    while batch_tile > 256 and tile_vmem(batch_tile) > _VMEM_CAP - (4 << 20):
        batch_tile = max(_ROW_ALIGN, _round_up(batch_tile // 2, _ROW_ALIGN))

    try:  # never request more than half the physical VMEM of this chip
        hw_cap = pltpu.get_tpu_info().vmem_capacity_bytes // 2
    except Exception:
        hw_cap = _VMEM_CAP
    vmem_limit = int(min(max(2 * tile_vmem(batch_tile), 8 * 1024 * 1024),
                         min(_VMEM_CAP, hw_cap)))

    # ---- ragged batch -> zero-pad, slice afterwards --------------------------
    b_pad = _round_up(B, batch_tile)
    x = state if b_pad == B else jnp.pad(state, ((0, b_pad - B), (0, 0)))
    grid = (b_pad // batch_tile,)

    def const_spec(shape):
        # Whole array, identical block at every grid step (never re-fetched).
        return pl.BlockSpec(shape, lambda i: (0, 0))

    out_padded = pl.pallas_call(
        functools.partial(actor_kernel, mxu_dtype=mxu_dtype),
        out_shape=jax.ShapeDtypeStruct((b_pad, a_pad), jnp.float32),
        grid_spec=pltpu.PrefetchScalarGridSpec(
            num_scalar_prefetch=0,
            grid=grid,
            in_specs=[
                pl.BlockSpec((batch_tile, state_dim), lambda i: (i, 0)),  # state tile
                const_spec(w1.shape), const_spec(b1.shape),
                const_spec(w2.shape), const_spec(b2.shape),
                const_spec(w3.shape), const_spec(b3.shape),
            ],
            out_specs=pl.BlockSpec((batch_tile, a_pad), lambda i: (i, 0)),
        ),
        compiler_params=pltpu.CompilerParams(
            dimension_semantics=("parallel",),
            vmem_limit_bytes=vmem_limit),
    )(x, w1, b1, w2, b2, w3, b3)

    return out_padded[:B, :action_dim]


def init_params(key, state_dim, action_dim):
    """Deterministic synthetic parameters (shapes match the nn.Linear layers)."""
    ks = jax.random.split(key, 6)

    def lin(kw, kb, fan_in, fan_out):
        bound = 1.0 / jnp.sqrt(fan_in)
        w = jax.random.uniform(kw, (fan_in, fan_out), jnp.float32, -bound, bound)
        b = jax.random.uniform(kb, (1, fan_out), jnp.float32, -bound, bound)
        return w, b

    w1, b1 = lin(ks[0], ks[1], state_dim, 256)
    w2, b2 = lin(ks[2], ks[3], 256, 64)
    w3, b3 = lin(ks[4], ks[5], 64, action_dim)
    return {"w1": w1, "b1": b1, "w2": w2, "b2": b2, "w3": w3, "b3": b3}


def reference_forward(state, p):
    h1 = jax.nn.relu(state @ p["w1"] + p["b1"])
    h2 = jax.nn.relu(h1 @ p["w2"] + p["b2"])
    return jax.nn.softmax(h2 @ p["w3"] + p["b3"], axis=-1)


if __name__ == "__main__":
    key = jax.random.PRNGKey(0)
    k_param, k_state = jax.random.split(key)

    state_dim, action_dim, batch = 32, 6, 16
    params = init_params(k_param, state_dim, action_dim)
    state = jax.random.normal(k_state, (batch, state_dim), jnp.float32)

    ref = reference_forward(state, params)

    # Default fast path: bf16 MXU operands, whole batch in one grid step.
    prepped_bf16 = prepare_params(params, use_bf16=True)
    probs = jax.block_until_ready(discrete_actor_forward(state, prepped_bf16))
    assert probs.shape == (batch, action_dim)
    # Softmax runs fully in f32 with exact reciprocal -> rows sum to ~1 exactly.
    assert jnp.allclose(jnp.sum(probs, axis=-1), 1.0, atol=1e-3)
    # Tolerance accounts for bf16 MXU operands.
    assert jnp.allclose(probs, ref, atol=3e-2, rtol=3e-2)

    # f32 operands -> tight agreement with the pure-JAX reference.
    prepped_f32 = prepare_params(params, use_bf16=False)
    probs_f32 = jax.block_until_ready(discrete_actor_forward(state, prepped_f32))
    assert jnp.allclose(probs_f32, ref, atol=5e-3, rtol=5e-3)

    # Ragged batch + multi-step grid path.  batch_tile=16 here is ONLY to
    # exercise padding and the >1-step pipeline at a small test size; the
    # default tile selection is much larger.
    state_r = jax.random.normal(jax.random.PRNGKey(1), (40, state_dim), jnp.float32)
    probs_r = jax.block_until_ready(
        discrete_actor_forward(state_r, prepped_f32, batch_tile=16))
    assert probs_r.shape == (40, action_dim)
    assert jnp.allclose(probs_r, reference_forward(state_r, params),
                        atol=5e-3, rtol=5e-3)

    print("KERNEL_OK")
</pallas_src>

<mosaic_0001>
module attributes {stable_mosaic.version = 11 : i64} {
  func.func @actor_kernel(%arg0: i32, %arg1: memref<16x32xf32, #tpu.memory_space<vmem>>, %arg2: memref<32x256xbf16, #tpu.memory_space<vmem>>, %arg3: memref<1x256xf32, #tpu.memory_space<vmem>>, %arg4: memref<256x128xbf16, #tpu.memory_space<vmem>>, %arg5: memref<1x128xf32, #tpu.memory_space<vmem>>, %arg6: memref<128x8xbf16, #tpu.memory_space<vmem>>, %arg7: memref<1x8xf32, #tpu.memory_space<vmem>>, %arg8: memref<16x8xf32, #tpu.memory_space<vmem>>) attributes {dimension_semantics = [#tpu.dimension_semantics<parallel>], iteration_bounds = array<i64: 1>, scalar_prefetch = 0 : i64, scratch_operands = 0 : i64, tpu.core_type = #tpu.core_type<tc>, window_params = [{transform_indices = @transform_0, window_bounds = array<i64: 16, 32>}, {pipeline_mode = #tpu.pipeline_mode<synchronous>, transform_indices = @transform_1, window_bounds = array<i64: 32, 256>}, {pipeline_mode = #tpu.pipeline_mode<synchronous>, transform_indices = @transform_2, window_bounds = array<i64: 1, 256>}, {pipeline_mode = #tpu.pipeline_mode<synchronous>, transform_indices = @transform_3, window_bounds = array<i64: 256, 128>}, {pipeline_mode = #tpu.pipeline_mode<synchronous>, transform_indices = @transform_4, window_bounds = array<i64: 1, 128>}, {pipeline_mode = #tpu.pipeline_mode<synchronous>, transform_indices = @transform_5, window_bounds = array<i64: 128, 8>}, {pipeline_mode = #tpu.pipeline_mode<synchronous>, transform_indices = @transform_6, window_bounds = array<i64: 1, 8>}, {transform_indices = @transform_7, window_bounds = array<i64: 16, 8>}]} {
    %c0 = arith.constant 0 : index
    %c0_0 = arith.constant 0 : index
    %0 = vector.load %arg1[%c0, %c0_0] : memref<16x32xf32, #tpu.memory_space<vmem>>, vector<16x32xf32>
    %1 = arith.truncf %0 : vector<16x32xf32> to vector<16x32xbf16>
    %c0_1 = arith.constant 0 : index
    %c0_2 = arith.constant 0 : index
    %2 = vector.load %arg2[%c0_1, %c0_2] : memref<32x256xbf16, #tpu.memory_space<vmem>>, vector<32x256xbf16>
    %cst = arith.constant dense<0.000000e+00> : vector<16x256xf32>
    %3 = tpu.matmul %1, %2, %cst {dimension_numbers = #tpu.dot_dimension_numbers<[1], [0], [0], [1], [0, 0, 1, 1], [], []>} : vector<16x32xbf16>, vector<32x256xbf16>, vector<16x256xf32> -> vector<16x256xf32>
    %c0_3 = arith.constant 0 : index
    %c0_4 = arith.constant 0 : index
    %4 = vector.load %arg3[%c0_3, %c0_4] : memref<1x256xf32, #tpu.memory_space<vmem>>, vector<1x256xf32>
    %5 = vector.broadcast %4 : vector<1x256xf32> to vector<16x256xf32>
    %6 = arith.addf %3, %5 : vector<16x256xf32>
    %cst_5 = arith.constant 0.000000e+00 : f32
    %7 = vector.broadcast %cst_5 : f32 to vector<16x256xf32>
    %8 = arith.maximumf %6, %7 : vector<16x256xf32>
    %9 = arith.truncf %8 : vector<16x256xf32> to vector<16x256xbf16>
    %c0_6 = arith.constant 0 : index
    %c0_7 = arith.constant 0 : index
    %10 = vector.load %arg4[%c0_6, %c0_7] : memref<256x128xbf16, #tpu.memory_space<vmem>>, vector<256x128xbf16>
    %cst_8 = arith.constant dense<0.000000e+00> : vector<16x128xf32>
    %11 = tpu.matmul %9, %10, %cst_8 {dimension_numbers = #tpu.dot_dimension_numbers<[1], [0], [0], [1], [0, 0, 1, 1], [], []>} : vector<16x256xbf16>, vector<256x128xbf16>, vector<16x128xf32> -> vector<16x128xf32>
    %c0_9 = arith.constant 0 : index
    %c0_10 = arith.constant 0 : index
    %12 = vector.load %arg5[%c0_9, %c0_10] : memref<1x128xf32, #tpu.memory_space<vmem>>, vector<1x128xf32>
    %13 = vector.broadcast %12 : vector<1x128xf32> to vector<16x128xf32>
    %14 = arith.addf %11, %13 : vector<16x128xf32>
    %cst_11 = arith.constant 0.000000e+00 : f32
    %15 = vector.broadcast %cst_11 : f32 to vector<16x128xf32>
    %16 = arith.maximumf %14, %15 : vector<16x128xf32>
    %17 = arith.truncf %16 : vector<16x128xf32> to vector<16x128xbf16>
    %c0_12 = arith.constant 0 : index
    %c0_13 = arith.constant 0 : index
    %18 = vector.load %arg6[%c0_12, %c0_13] : memref<128x8xbf16, #tpu.memory_space<vmem>>, vector<128x8xbf16>
    %cst_14 = arith.constant dense<0.000000e+00> : vector<16x8xf32>
    %19 = tpu.matmul %17, %18, %cst_14 {dimension_numbers = #tpu.dot_dimension_numbers<[1], [0], [0], [1], [0, 0, 1, 1], [], []>} : vector<16x128xbf16>, vector<128x8xbf16>, vector<16x8xf32> -> vector<16x8xf32>
    %c0_15 = arith.constant 0 : index
    %c0_16 = arith.constant 0 : index
    %20 = vector.load %arg7[%c0_15, %c0_16] : memref<1x8xf32, #tpu.memory_space<vmem>>, vector<1x8xf32>
    %21 = vector.broadcast %20 : vector<1x8xf32> to vector<16x8xf32>
    %22 = arith.addf %19, %21 : vector<16x8xf32>
    %cst_17 = arith.constant dense<0xFF800000> : vector<16xf32>
    %23 = vector.multi_reduction <maximumf>, %22, %cst_17 [1] : vector<16x8xf32> to vector<16xf32>
    %24 = vector.shape_cast %23 : vector<16xf32> to vector<16x1xf32>
    %25 = vector.broadcast %24 : vector<16x1xf32> to vector<16x8xf32>
    %26 = arith.subf %22, %25 : vector<16x8xf32>
    %27 = math.exp %26 : vector<16x8xf32>
    %cst_18 = arith.constant dense<0.000000e+00> : vector<16xf32>
    %28 = vector.multi_reduction <add>, %27, %cst_18 [1] : vector<16x8xf32> to vector<16xf32>
    %29 = vector.shape_cast %28 : vector<16xf32> to vector<16x1xf32>
    %30 = tpu.reciprocal %29 : vector<16x1xf32> -> vector<16x1xf32>
    %31 = vector.broadcast %30 : vector<16x1xf32> to vector<16x8xf32>
    %32 = arith.mulf %27, %31 : vector<16x8xf32>
    %c0_19 = arith.constant 0 : index
    %c0_20 = arith.constant 0 : index
    %33 = vector.load %arg8[%c0_19, %c0_20] : memref<16x8xf32, #tpu.memory_space<vmem>>, vector<16x8xf32>
    tpu.vector_store %arg8[%c0_19, %c0_20], %32 {strides = array<i32>} : memref<16x8xf32, #tpu.memory_space<vmem>>, vector<16x8xf32>,
    return
  }
  func.func @transform_0(%arg0: i32) -> (i32, i32) {
    %c0_i32 = arith.constant 0 : i32
    %c0_i32_0 = arith.constant 0 : i32
    return %arg0, %c0_i32 : i32, i32
  }
  func.func @transform_1(%arg0: i32) -> (i32, i32) {
    %c0_i32 = arith.constant 0 : i32
    %c0_i32_0 = arith.constant 0 : i32
    %c0_i32_1 = arith.constant 0 : i32
    return %c0_i32, %c0_i32_0 : i32, i32
  }
  func.func @transform_2(%arg0: i32) -> (i32, i32) {
    %c0_i32 = arith.constant 0 : i32
    %c0_i32_0 = arith.constant 0 : i32
    %c0_i32_1 = arith.constant 0 : i32
    return %c0_i32, %c0_i32_0 : i32, i32
  }
  func.func @transform_3(%arg0: i32) -> (i32, i32) {
    %c0_i32 = arith.constant 0 : i32
    %c0_i32_0 = arith.constant 0 : i32
    %c0_i32_1 = arith.constant 0 : i32
    return %c0_i32, %c0_i32_0 : i32, i32
  }
  func.func @transform_4(%arg0: i32) -> (i32, i32) {
    %c0_i32 = arith.constant 0 : i32
    %c0_i32_0 = arith.constant 0 : i32
    %c0_i32_1 = arith.constant 0 : i32
    return %c0_i32, %c0_i32_0 : i32, i32
  }
  func.func @transform_5(%arg0: i32) -> (i32, i32) {
    %c0_i32 = arith.constant 0 : i32
    %c0_i32_0 = arith.constant 0 : i32
    %c0_i32_1 = arith.constant 0 : i32
    return %c0_i32, %c0_i32_0 : i32, i32
  }
  func.func @transform_6(%arg0: i32) -> (i32, i32) {
    %c0_i32 = arith.constant 0 : i32
    %c0_i32_0 = arith.constant 0 : i32
    %c0_i32_1 = arith.constant 0 : i32
    return %c0_i32, %c0_i32_0 : i32, i32
  }
  func.func @transform_7(%arg0: i32) -> (i32, i32) {
    %c0_i32 = arith.constant 0 : i32
    %c0_i32_0 = arith.constant 0 : i32
    return %arg0, %c0_i32 : i32, i32
  }
}

</mosaic_0001>

<bundles_post_ra>
// kernel: tpu_custom_call.1
= control target key start
LH: loop header
LB: loop body
LE: loop exit
PB: predicated region body
PF: predicated region fallthrough
CT: control target
= control target key end

     0   :  { %12 = vsyncpa [#allocation3], 0  ;;  %s604_s24 = smov [#allocation2]   ;;  %s725_s0 = inlined_call_operand.vmem [shape: f32[16,32], index: 0, kind: input, shape index: {}]   ;;  %s726_s1 = inlined_call_operand.vmem [shape: bf16[32,256], index: 1, kind: input, shape index: {}]   ;;  %s727_s2 = inlined_call_operand.vmem [shape: f32[1,256], index: 2, kind: input, shape index: {}]   ;;  %s728_s3 = inlined_call_operand.hbm [shape: bf16[256,128], index: 3, kind: input, shape index: {}]   ;;  %s729_s4 = inlined_call_operand.vmem [shape: f32[1,128], index: 4, kind: input, shape index: {}]   ;;  %s730_s5 = inlined_call_operand.vmem [shape: bf16[128,8], index: 5, kind: input, shape index: {}]   ;;  %s731_s6 = inlined_call_operand.vmem [shape: f32[1,8], index: 6, kind: input, shape index: {}]   ;;  %s732_s7 = inlined_call_operand.vmem [shape: f32[16,8], index: 7, kind: output, shape index: {}]  }
   0x1   :  { %s24_s25 = sshll.u32 %s604_s24, 4  ;;  %s580_s28 = scalar_lea.hbm %s728_s3, 2048  ;;  %s25_s25 = int_to_ptr.vmem [resolvable:$true] %s24_s25 }
   0x2   :  { %p581_p0 = scmp.ne.s32.totalorder %s728_s3, %s580_s28  ;;  %p584_p1 = scmp.lt.u32.totalorder %s580_s28, %s728_s3 }
   0x4   :  { %p586_p2 = pnand %p584_p1, %p581_p0 }
   0x6   :  { %589 = shalt.err (!%p586_p2)
}
   0x7   :  { %s590_s10 = scalar_lea.vmem %s25_s25, 2048  ;;  %p595_p4 = scmp.lt.s32.totalorder %s25_s25, %s25_s25 }
   0x8   :  { %p591_p3 = scmp.ne.s32.totalorder %s25_s25, %s590_s10  ;;  %p596_p5 = scmp.lt.s32.totalorder %s590_s10, %s590_s10 }
   0xa   :  { %p597_p6 = por %p596_p5, %p595_p4 }
   0xc   :  { %p598_p7 = pnand %p597_p6, %p591_p3 }
   0xe   :  { %601 = shalt.err (!%p598_p7)
}
   0xf   :  { %s605_s11 = smov 64   ;;  %s606_s12 = smov 4  }
  0x10   :  { %30 = dma.hbm_to_vmem [thread:$0]  %s728_s3, 2048, %s25_s25, [#allocation3], %s605_s11, %s605_s11, %s606_s12  }
  0x11   :  { %602 = dma.done.wait [#allocation3], 2048  }
  0x12   :  { %603 = vsyncadd [#allocation3], 4294965248  ;;  %v607_v0 = vmov 0   ;;  %v542_v1 = vld [vmem:[%s726_s1 + $0x4] ss:$8 sps:$4 sm:$0xff]   ;;  %vm80_vm0 = vcmask 261120   ;;  %v50_v30 = vlaneseq }
  0x13   :  { %116 = vmatprep.mubr.bf16.mxu0 %v607_v0  ;;  %v544_v2 = vld [vmem:[%s726_s1] ss:$8 sps:$4 sm:$0xff]   ;;  %84 = vmatprep.subr.bf16.mxu0 %v542_v1  ;;  %v545_v3 = vld [vmem:[%s726_s1 + $0x14] ss:$8 sps:$4 sm:$0xff]   ;;  %v547_v4 = vld [vmem:[%s726_s1 + $0x10] ss:$8 sps:$4 sm:$0xff]  }
  0x14   :  { %v41_v5 = vld [vmem:[%s725_s0] sm:$0xff]  ;;  %85 = vmatpush1.bf16.msra.mxu0 %v544_v2  ;;  %v42_v6 = vld [vmem:[%s725_s0 + $0x8] sm:$0xff]  ;;  %v552_v12 = vld [vmem:[#allocation2 + $0x50] sm:$0xff]   ;;  %v608_v25 = vmov 0.0   ;;  %v51_v31 = vshrl.u32 %v50_v30, 7  ;;  %vm609_vm1 = vmmov 0  }
  0x15   :  { %86 = vmatprep.subr.bf16.mxu0 %v545_v3  ;;  %v548_v7 = vld [vmem:[#allocation2 + $0x40] sm:$0xff]   ;;  %v43_v9 = vpack.c.bf16 %v42_v6, %v41_v5  ;;  %v550_v10 = vld [vmem:[#allocation2 + $0x48] sm:$0xff]   ;;  %v553_v13 = vld [vmem:[#allocation2 + $0x10] sm:$0xff]   ;;  %vm424_vm2 = vcmask 64512  }
  0x16   :  { %v549_v8 = vld [vmem:[#allocation2] sm:$0xff]   ;;  %485 = vmatprep.subr.bf16.mxu1 %v548_v7  ;;  %v551_v11 = vld [vmem:[#allocation2 + $0x8] sm:$0xff]   ;;  %v554_v14 = vld [vmem:[#allocation2 + $0x58] sm:$0xff]   ;;  %v52_v32 = vsub.s32 0, %v51_v31  ;;  %v56_v34 = vsub.s32 1, %v51_v31 }
  0x17   :  { %486 = vmatpush3.bf16.msra.mxu1 %v549_v8  ;;  %v555_v15 = vld [vmem:[#allocation2 + $0x18] sm:$0xff]   ;;  %v556_v16 = vld [vmem:[#allocation2 + $0x60] sm:$0xff]   ;;  %v558_v18 = vld [vmem:[#allocation2 + $0x68] sm:$0xff]  }
  0x18   :  { %87 = vmatpush1.bf16.msra.mxu0 %v547_v4  ;;  %487 = vmatprep.subr.bf16.mxu1 %v550_v10  ;;  %v557_v17 = vld [vmem:[#allocation2 + $0x20] sm:$0xff]   ;;  %v559_v19 = vld [vmem:[#allocation2 + $0x28] sm:$0xff]   ;;  %v560_v20 = vld [vmem:[#allocation2 + $0x70] sm:$0xff]  }
  0x19   :  { %v561_v21 = vld [vmem:[#allocation2 + $0x30] sm:$0xff]   ;;  %v562_v22 = vld [vmem:[#allocation2 + $0x78] sm:$0xff]   ;;  %v564_v24 = vld [vmem:[%s730_s5] sm:$0xff]   ;;  %516 = vmatprep.subr.bf16.mxu0 %v608_v25 }
  0x1a   :  { %v563_v23 = vld [vmem:[#allocation2 + $0x38] sm:$0xff]   ;;  %v565_v26 = vld [vmem:[%s730_s5 + $0x8] sm:$0xff]   ;;  %v566_v27 = vld [vmem:[%s730_s5 + $0x10] sm:$0xff]  }
  0x1b   :  { %458 = vmatmul.mubr.msk.bf16.vlgmr.msra.gmra.mrb[0].mxu0 %vm80_vm0, %v43_v9  ;;  %488 = vmatpush3.bf16.msra.mxu1 %v551_v11  ;;  %v567_v28 = vld [vmem:[%s730_s5 + $0x18] sm:$0xff]   ;;  %v568_v29 = vld [vmem:[%s730_s5 + $0x20] sm:$0xff]   ;;  %v569_v51 = vld [vmem:[%s730_s5 + $0x28] sm:$0xff]  }
  0x1c   :  { %489 = vmatprep.subr.bf16.mxu1 %v552_v12  ;;  %517 = vmatpush3.bf16.msra.mxu0 %v564_v24  ;;  %v48_v33 = vld [vmem:[%s727_s2] sm:$0x3]  ;;  %v570_v52 = vld [vmem:[%s730_s5 + $0x30] sm:$0xff]   ;;  %v571_v53 = vld [vmem:[%s730_s5 + $0x38] sm:$0xff]  }
  0x1d   :  { %518 = vmatprep.subr.bf16.mxu0 %v608_v25  ;;  %v53_v35 = vrot.slane %v48_v33, %v52_v32  ;;  %v57_v36 = vrot.slane %v48_v33, %v56_v34  ;;  %532 = vmatprep.mubr.msk.bf16.mxu0 %vm609_vm1, %v608_v25  ;;  %v459_v55 = vld [vmem:[%s729_s4] ss:$0 sm:$0xff] }
  0x1e   :  { %v476_v2 = vld [vmem:[%s731_s6] ss:$0 sm:$0xff] }
  0x1f   :  { %490 = vmatpush3.bf16.msra.mxu1 %v553_v13 }
  0x20   :  { %491 = vmatprep.subr.bf16.mxu1 %v554_v14  ;;  %519 = vmatpush3.bf16.msra.mxu0 %v565_v26 }
  0x21   :  { %520 = vmatprep.subr.bf16.mxu0 %v608_v25 }
  0x23   :  { %492 = vmatpush3.bf16.msra.mxu1 %v555_v15 }
  0x24   :  { %493 = vmatprep.subr.bf16.mxu1 %v556_v16  ;;  %521 = vmatpush3.bf16.msra.mxu0 %v566_v27 }
  0x25   :  { %522 = vmatprep.subr.bf16.mxu0 %v608_v25 }
  0x27   :  { %494 = vmatpush3.bf16.msra.mxu1 %v557_v17 }
  0x28   :  { %495 = vmatprep.subr.bf16.mxu1 %v558_v18  ;;  %523 = vmatpush3.bf16.msra.mxu0 %v567_v28 }
  0x29   :  { %524 = vmatprep.subr.bf16.mxu0 %v608_v25 }
  0x2b   :  { %496 = vmatpush3.bf16.msra.mxu1 %v559_v19 }
  0x2c   :  { %497 = vmatprep.subr.bf16.mxu1 %v560_v20  ;;  %525 = vmatpush3.bf16.msra.mxu0 %v568_v29 }
  0x2d   :  { %526 = vmatprep.subr.bf16.mxu0 %v608_v25 }
  0x2f   :  { %498 = vmatpush3.bf16.msra.mxu1 %v561_v21 }
  0x30   :  { %499 = vmatprep.subr.bf16.mxu1 %v562_v22  ;;  %527 = vmatpush3.bf16.msra.mxu0 %v569_v51 }
  0x31   :  { %528 = vmatprep.subr.bf16.mxu0 %v608_v25 }
  0x33   :  { %500 = vmatpush3.bf16.msra.mxu1 %v563_v23 }
  0x34   :  { %529 = vmatpush3.bf16.msra.mxu0 %v570_v52 }
  0x35   :  { %530 = vmatprep.subr.bf16.mxu0 %v608_v25 }
  0x38   :  { %531 = vmatpush3.bf16.msra.mxu0 %v571_v53 }
  0xee   :  { %v118_v37 = vpop.f32.mrb[0].mxu0 }
  0xef   :  { %v119_v38 = vadd.f32 %v118_v37, %v53_v35  ;;  %v120_v39 = vpop.f32.mrb[1].mxu0 }
  0xf0   :  { %v121_v40 = vadd.f32 %v120_v39, %v57_v36  ;;  %v122_v41 = vpop.f32.mrb[2].mxu0 }
  0xf1   :  { %v123_v42 = vadd.f32 %v122_v41, %v53_v35  ;;  %v124_v43 = vpop.f32.mrb[3].mxu0  ;;  %v127_v45 = vmax.f32 %v119_v38, 0.0 }
  0xf2   :  { %v125_v44 = vadd.f32 %v124_v43, %v57_v36  ;;  %v128_v47 = vmax.f32 %v121_v40, 0.0 }
  0xf3   :  { %v129_v46 = vmax.f32 %v123_v42, 0.0 }
  0xf4   :  { %v130_v48 = vmax.f32 %v125_v44, 0.0 }
  0xf5   :  { %v131_v49 = vpack.c.bf16 %v129_v46, %v127_v45 }
  0xf6   :  { %v132_v50 = vpack.c.bf16 %v130_v48, %v128_v47 }
  0xf8   :  { %300 = vmatprep.mubr.bf16.mxu1 %v132_v50 }
  0xf9   :  { %301 = vmatmul.mubr.bf16.vlgmr.msra.gmra.mrb[0].mxu1 %v131_v49 }
 0x1cc   :  { %v501_v54 = vpop.f32.mrb[0].mxu1 }
 0x1cd   :  { %v502_v56 = vpop.f32.mrb[1].mxu1 }
 0x1ce   :  { %v503_v57 = vadd.f32 %v502_v56, %v501_v54  ;;  %v504_v58 = vpop.f32.mrb[2].mxu1 }
 0x1cf   :  { %v505_v59 = vpop.f32.mrb[3].mxu1 }
 0x1d0   :  { %v303_v60 = vadd.f32 %v503_v57, %v459_v55  ;;  %v506_v61 = vadd.f32 %v505_v59, %v504_v58 }
 0x1d2   :  { %v306_v62 = vadd.f32 %v506_v61, %v459_v55  ;;  %v309_v63 = vmax.f32 %v303_v60, 0.0 }
 0x1d4   :  { %v310_v0 = vmax.f32 %v306_v62, 0.0 }
 0x1d6   :  { %v311_v1 = vpack.c.bf16 %v310_v0, %v309_v63 }
 0x1d8   :  { %533 = vmatmul.mubr.bf16.vlgmr.msra.gmra.mrb[4].mxu0 %v311_v1 }
 0x2ab   :  { %v417_v3 = vpop.f32.mrb[4].mxu0 }
 0x2ac   :  { %v418_v4 = vadd.f32 %v476_v2, %v417_v3  ;;  %v534_v5 = vpop.f32.mrb[5].mxu0 }
 0x2ad   :  { %v420_v6 = vpop.f32.mrb[6].mxu0 }
 0x2ae   :  { %v421_v7 = vadd.f32 %v476_v2, %v420_v6  ;;  %v535_v8 = vpop.f32.mrb[7].mxu0  ;;  %v425_v9 = vsel %vm424_vm2, %v418_v4, -inf }
 0x2af   :  { %426 = vmax.xlane.f32.xlu0 %v425_v9 }
 0x2b0   :  { %v428_v10 = vsel %vm424_vm2, %v421_v7, -inf }
 0x2b3   :  { %429 = vmax.xlane.f32.xlu0 %v428_v10 }
 0x33c   :  { %v427_v11 = vpop.xlane.xlu0 %426 }
 0x33d   :  { %v431_v12 = vsub.f32 %v418_v4, %v427_v11 }
 0x33f   :  { %v433_v13 = vmul.f32 1.442695, %v431_v12 }
 0x340   :  { %v430_v14 = vpop.xlane.xlu0 %429 }
 0x341   :  { %572 = vpow2.f32 %v433_v13  ;;  %v432_v15 = vsub.f32 %v421_v7, %v430_v14 }
 0x343   :  { %v435_v16 = vmul.f32 1.442695, %v432_v15 }
 0x345   :  { %574 = vpow2.f32 %v435_v16 }
 0x34b   :  { %v573_v17 = vpop.eup %572 }
 0x34c   :  { %v437_v18 = vsel %vm424_vm2, %v573_v17, 0.0 }
 0x34d   :  { %438 = vadd.xlane.f32.xlu1 %v437_v18 }
 0x34f   :  { %v575_v19 = vpop.eup %574 }
 0x350   :  { %v440_v20 = vsel %vm424_vm2, %v575_v19, 0.0 }
 0x351   :  { %441 = vadd.xlane.f32.xlu1 %v440_v20 }
 0x3da   :  { %v439_v21 = vpop.xlane.xlu1 %438 }
 0x3db   :  { %576 = vrcp.f32 %v439_v21 }
 0x3de   :  { %v442_v22 = vpop.xlane.xlu1 %441 }
 0x3df   :  { %578 = vrcp.f32 %v442_v22 }
 0x3e5   :  { %v577_v23 = vpop.eup %576 }
 0x3e6   :  { %v445_v24 = vmul.f32 %v577_v23, %v573_v17 }
 0x3e8   :  { %447 = vst.msk [vmem:[%s732_s7] sm:$0xff] %vm424_vm2, %v445_v24 }
 0x3e9   :  { %v579_v25 = vpop.eup %578 }
 0x3ea   :  { %v446_v26 = vmul.f32 %v579_v25, %v575_v19 }
 0x3ec   :  { %448 = vst.msk [vmem:[%s732_s7 + $0x8] sm:$0xff] %vm424_vm2, %v446_v26 }
 0x3ed   :  { %453 = vsyncpa [#allocation3], 1 }

</bundles_post_ra>
